<compile_context>
chip_gen: v5e
topology: v5e:2x2
jax: 0.10.0
libtpu: 0.0.40
codegen_flags: <defaults>
</compile_context>

<pallas_src>
from functools import lru_cache, partial

import numpy as np
import jax
import jax.numpy as jnp
from jax.experimental import pallas as pl
from jax.experimental.pallas import tpu as pltpu


# ----------------------------------------------------------------------------
# Hardware-aware sizing helpers
# ----------------------------------------------------------------------------
def _vmem_capacity_bytes():
    try:
        info = pltpu.get_tpu_info()
        for name in ("vmem_capacity_bytes", "vmem_size_bytes", "vmem_bytes"):
            v = getattr(info, name, None)
            if v:
                return int(v)
    except Exception:
        pass
    return 64 * 1024 * 1024          # conservative default (v7x per-TC VMEM)


def _vmem_limit_bytes():
    cap = _vmem_capacity_bytes()
    return int(max(32 * 1024 * 1024, min(0.6 * cap, 100 * 1024 * 1024)))


# ----------------------------------------------------------------------------
# Pallas kernels
# ----------------------------------------------------------------------------
def _make_modconv_kernel(has_prev: bool, fuse_up: bool):
    """rgb = wblk @ x (+ prev); optionally rgb @ kron(upsample+blur).  All 2D MXU."""

    def kernel(*refs):
        refs = list(refs)
        wblk_ref = refs.pop(0)                            # (B*O, B*C)  f32
        x_ref = refs.pop(0)                               # (B*C, HW)   f32
        prev_ref = refs.pop(0) if has_prev else None      # (B*O, HW)   f32
        mup_ref = refs.pop(0) if fuse_up else None        # (HW, COLS)  bf16
        o_ref = refs.pop(0)                               # (B*O, HW|COLS) f32

        rgb = jnp.dot(wblk_ref[...], x_ref[...],
                      preferred_element_type=jnp.float32)             # (B*O, HW)
        if has_prev:
            rgb = rgb + prev_ref[...]
        if fuse_up:
            mup = mup_ref[...]
            o_ref[...] = jnp.dot(rgb.astype(mup.dtype), mup,
                                 preferred_element_type=jnp.float32)  # (B*O, COLS)
        else:
            o_ref[...] = rgb

    return kernel


def _make_separable_kernel(o_chan: int, h: int, w: int):
    """Per-batch separable upsample+blur: out_c = Mrow @ img_c @ Mcol."""
    merge_rows = (h % 8 == 0)    # (O, H, W) -> (O*H, W) is a tile-aligned merge

    def kernel(rgb_ref, mrow_ref, mcol_ref, o_ref):
        mrow = mrow_ref[...]                              # (2H, H)  bf16
        mcol = mcol_ref[...]                              # (W, 2W)  bf16
        if merge_rows:
            # Fold O into the matmul M dim (bigger MXU occupancy, denser stores).
            xs = rgb_ref[0].reshape(o_chan * h, w).astype(mcol.dtype)
            y1 = jnp.dot(xs, mcol, preferred_element_type=jnp.float32)   # (O*H, 2W)
            y1 = y1.reshape(o_chan, h, 2 * w)
            for oc in range(o_chan):
                o_ref[0, oc] = jnp.dot(mrow, y1[oc].astype(mrow.dtype),
                                       preferred_element_type=jnp.float32)
        else:
            for oc in range(o_chan):
                t = jnp.dot(rgb_ref[0, oc].astype(mcol.dtype), mcol,
                            preferred_element_type=jnp.float32)          # (H, 2W)
                o_ref[0, oc] = jnp.dot(mrow, t.astype(mrow.dtype),
                                       preferred_element_type=jnp.float32)

    return kernel


# ----------------------------------------------------------------------------
# Constant matrices for upsample + blur (host side, cached per (H, W))
# ----------------------------------------------------------------------------
def _bilinear_upsample_matrix(n):
    # nn.Upsample(scale_factor=2, mode='bilinear', align_corners=False), 1D factor.
    i = np.arange(2 * n)
    src = np.maximum((i + 0.5) / 2.0 - 0.5, 0.0)
    i0 = np.clip(np.floor(src).astype(np.int64), 0, n - 1)
    i1 = np.clip(i0 + 1, 0, n - 1)
    w1 = src - i0
    w0 = 1.0 - w1
    u = np.zeros((2 * n, n), np.float32)
    u[np.arange(2 * n), i0] += w0
    u[np.arange(2 * n), i1] += w1
    return u


def _blur_matrix(m):
    # 1D [1, 2, 1] / 4 blur with reflect padding (kornia filter2d default border).
    f = np.array([1.0, 2.0, 1.0], np.float32) / 4.0
    b = np.zeros((m, m), np.float32)
    for i in range(m):
        for k, d in enumerate((-1, 0, 1)):
            j = i + d
            if j < 0:
                j = -j
            if j >= m:
                j = 2 * m - 2 - j
            b[i, j] += f[k]
    return b


@lru_cache(maxsize=None)
def _upsample_blur_matrices(h, w):
    mrow = _blur_matrix(2 * h) @ _bilinear_upsample_matrix(h)          # (2H, H)
    mcol = (_blur_matrix(2 * w) @ _bilinear_upsample_matrix(w)).T      # (W, 2W)
    return mrow.astype(np.float32), mcol.astype(np.float32)


@lru_cache(maxsize=None)
def _fused_upsample_matrix(h, w):
    # M[h*W + w, h2*2W + w2] = Mrow[h2, h] * Mcol[w, w2]  ==  kron(Mrow^T, Mcol)
    mrow, mcol = _upsample_blur_matrices(h, w)
    return np.kron(mrow.T, mcol).astype(np.float32)                    # (HW, 4*HW)


# Device-array caches: constants are passed as explicit kernel arguments (not
# baked into each jitted executable) and uploaded once per (H, W).
_DEVICE_CONST_CACHE = {}


def _fused_upsample_device(h, w):
    key = ("kron", h, w)
    if key not in _DEVICE_CONST_CACHE:
        _DEVICE_CONST_CACHE[key] = jnp.asarray(_fused_upsample_matrix(h, w),
                                               dtype=jnp.bfloat16)
    return _DEVICE_CONST_CACHE[key]


def _separable_device(h, w):
    key = ("sep", h, w)
    if key not in _DEVICE_CONST_CACHE:
        mrow, mcol = _upsample_blur_matrices(h, w)
        _DEVICE_CONST_CACHE[key] = (jnp.asarray(mrow, dtype=jnp.bfloat16),
                                    jnp.asarray(mcol, dtype=jnp.bfloat16))
    return _DEVICE_CONST_CACHE[key]


# ----------------------------------------------------------------------------
# Jitted pallas_call wrappers
# ----------------------------------------------------------------------------
@partial(jax.jit, static_argnames=("has_prev", "fuse_up", "ncol"))
def _rgb_modconv(x_nchw, prev_rgb, istyle, style_w, style_b, conv_w, mup, *,
                 has_prev, fuse_up, ncol):
    b, c, h, w = x_nchw.shape
    o = conv_w.shape[0]
    hw = h * w

    # Hoisted style Linear; modulation folded into the weights and packed
    # block-diagonally so the whole batch is ONE 2D matmul.
    style = istyle @ style_w.T + style_b                               # (B, C)
    wmod = conv_w[:, :, 0, 0][None] * (style + 1.0)[:, None, :]        # (B, O, C)
    eye = jnp.eye(b, dtype=wmod.dtype)
    wblk = (eye[:, None, :, None] * wmod[:, :, None, :]).reshape(b * o, b * c)

    x_flat = x_nchw.reshape(b * c, hw)                                 # free reshape
    prev_flat = prev_rgb.reshape(b * o, hw) if has_prev else None

    out_cols = mup.shape[1] if fuse_up else hw
    col_blk = out_cols // ncol

    inputs = [wblk, x_flat]
    in_specs = [
        pl.BlockSpec((b * o, b * c), lambda j: (0, 0)),
        pl.BlockSpec((b * c, hw), lambda j: (0, 0)),
    ]
    if has_prev:
        inputs.append(prev_flat)
        in_specs.append(pl.BlockSpec((b * o, hw), lambda j: (0, 0)))
    if fuse_up:
        inputs.append(mup)
        in_specs.append(pl.BlockSpec((hw, col_blk), lambda j: (0, j)))

    rgb = pl.pallas_call(
        _make_modconv_kernel(has_prev, fuse_up),
        out_shape=jax.ShapeDtypeStruct((b * o, out_cols), jnp.float32),
        grid=(ncol,),
        in_specs=in_specs,
        out_specs=pl.BlockSpec((b * o, col_blk), lambda j: (0, j)),
        compiler_params=pltpu.CompilerParams(
            dimension_semantics=("parallel",),
            vmem_limit_bytes=_vmem_limit_bytes()),
    )(*inputs)

    if fuse_up:
        return rgb.reshape(b, o, 2 * h, 2 * w)                         # free reshape
    return rgb.reshape(b, o, h, w)                                     # free reshape


@jax.jit
def _separable_upsample(rgb_nchw, mrow, mcol):
    b, o, h, w = rgb_nchw.shape
    return pl.pallas_call(
        _make_separable_kernel(o, h, w),
        out_shape=jax.ShapeDtypeStruct((b, o, 2 * h, 2 * w), jnp.float32),
        grid=(b,),
        in_specs=[
            pl.BlockSpec((1, o, h, w), lambda i: (i, 0, 0, 0)),
            pl.BlockSpec((2 * h, h), lambda i: (0, 0)),
            pl.BlockSpec((w, 2 * w), lambda i: (0, 0)),
        ],
        out_specs=pl.BlockSpec((1, o, 2 * h, 2 * w), lambda i: (i, 0, 0, 0)),
        compiler_params=pltpu.CompilerParams(
            dimension_semantics=("parallel",),
            vmem_limit_bytes=_vmem_limit_bytes()),
    )(rgb_nchw, mrow, mcol)


# ----------------------------------------------------------------------------
# Public wrapper (thin Python dispatch; constants are explicit arguments)
# ----------------------------------------------------------------------------
def rgb_block_forward(x_nchw, prev_rgb_nchw, istyle, params, upsample=True,
                      force_separable_upsample=False):
    b, c, h, w = x_nchw.shape
    hw = h * w
    has_prev = prev_rgb_nchw is not None

    # Fused-kron feasibility: the bf16 (HW, 4*HW) constant must fit ~25% of this
    # generation's VMEM (generation-aware: 64 MiB/TC on v7x, 128 MiB on v5e/v6e).
    kron_bytes = 4 * hw * hw * 2
    fuse_up = (upsample and not force_separable_upsample
               and kron_bytes <= _vmem_capacity_bytes() // 4)

    mup = _fused_upsample_device(h, w) if fuse_up else None
    # 2-way "parallel" split over the kron output columns keeps both v7x
    # TensorCores busy; it is a harmless 2-step loop on single-TC chips.
    ncol = 2 if (fuse_up and (2 * hw) % 128 == 0) else 1

    rgb = _rgb_modconv(x_nchw, prev_rgb_nchw, istyle,
                       params["style_w"], params["style_b"], params["conv_w"],
                       mup, has_prev=has_prev, fuse_up=fuse_up, ncol=ncol)
    if fuse_up or not upsample:
        return rgb

    # Large-resolution path: separable upsample+blur, one grid step per batch
    # element, O folded into the matmul M dim, bf16 constants.
    # TODO(synk): this path still round-trips the (B,O,H,W) conv output through
    #   HBM; a fully fused separable variant needs the 1x1 conv in (H, W) layout.
    mrow, mcol = _separable_device(h, w)
    return _separable_upsample(rgb, mrow, mcol)


# ----------------------------------------------------------------------------
# Pure-JAX reference (mirrors the PyTorch forward semantics)
# ----------------------------------------------------------------------------
def rgb_block_reference(x_nchw, prev_rgb_nchw, istyle, params, upsample=True):
    style = istyle @ params["style_w"].T + params["style_b"]    # (B, C)
    w = params["conv_w"][:, :, 0, 0]                            # (O, C)
    y = jnp.einsum("oc,bc,bchw->bohw", w, style + 1.0, x_nchw,
                   precision=jax.lax.Precision.HIGHEST)
    if prev_rgb_nchw is not None:
        y = y + prev_rgb_nchw
    if not upsample:
        return y

    def up_axis(a, axis):
        n = a.shape[axis]
        i = jnp.arange(2 * n)
        src = jnp.maximum((i + 0.5) / 2.0 - 0.5, 0.0)
        i0 = jnp.clip(jnp.floor(src).astype(jnp.int32), 0, n - 1)
        i1 = jnp.clip(i0 + 1, 0, n - 1)
        w1 = (src - i0).astype(a.dtype)
        w0 = 1.0 - w1
        shape = [1] * a.ndim
        shape[axis] = 2 * n
        return (jnp.take(a, i0, axis=axis) * w0.reshape(shape)
                + jnp.take(a, i1, axis=axis) * w1.reshape(shape))

    y = up_axis(up_axis(y, 2), 3)                               # bilinear x2
    yp = jnp.pad(y, ((0, 0), (0, 0), (1, 1), (0, 0)), mode="reflect")
    y = (yp[:, :, :-2] + 2.0 * yp[:, :, 1:-1] + yp[:, :, 2:]) / 4.0
    yp = jnp.pad(y, ((0, 0), (0, 0), (0, 0), (1, 1)), mode="reflect")
    y = (yp[..., :-2] + 2.0 * yp[..., 1:-1] + yp[..., 2:]) / 4.0
    return y


# ----------------------------------------------------------------------------
if __name__ == "__main__":
    B, L, C, H, W = 2, 32, 8, 16, 16     # batch, latent_dim, input_channel, spatial
    O = 3                                # rgba=False -> 3 output channels

    key = jax.random.PRNGKey(0)
    kx, kp, ks, kw1, kb1, kw2 = jax.random.split(key, 6)
    x = jax.random.normal(kx, (B, C, H, W), jnp.float32)
    prev_rgb = jax.random.normal(kp, (B, O, H, W), jnp.float32)
    istyle = jax.random.normal(ks, (B, L), jnp.float32)

    params = {
        # nn.Linear(latent_dim, input_channel): weight (C, L), bias (C,)
        "style_w": jax.random.normal(kw1, (C, L), jnp.float32) / np.sqrt(L),
        "style_b": 0.1 * jax.random.normal(kb1, (C,), jnp.float32),
        # Conv2DMod weight (out=3, in=C, 1, 1), kaiming_normal fan_in scale
        "conv_w": jax.random.normal(kw2, (O, C, 1, 1), jnp.float32) * np.sqrt(2.0 / C),
    }

    # 1) Main path: fused mod-conv + residual + kron upsample/blur (one kernel,
    #    batch collapsed, bf16 constants -> slightly looser atol).
    out = jax.block_until_ready(
        rgb_block_forward(x, prev_rgb, istyle, params, upsample=True))
    ref = jax.block_until_ready(
        rgb_block_reference(x, prev_rgb, istyle, params, upsample=True))
    assert out.shape == (B, O, 2 * H, 2 * W), out.shape
    np.testing.assert_allclose(np.asarray(out), np.asarray(ref), rtol=2e-2, atol=5e-2)

    # 2) No prev_rgb, no upsample (first RGBBlock of the network): all-f32 path.
    out2 = jax.block_until_ready(
        rgb_block_forward(x, None, istyle, params, upsample=False))
    ref2 = jax.block_until_ready(
        rgb_block_reference(x, None, istyle, params, upsample=False))
    assert out2.shape == (B, O, H, W), out2.shape
    np.testing.assert_allclose(np.asarray(out2), np.asarray(ref2), rtol=2e-2, atol=2e-2)

    # 3) Large-resolution (separable) path, forced at small size for coverage.
    out3 = jax.block_until_ready(
        rgb_block_forward(x, prev_rgb, istyle, params, upsample=True,
                          force_separable_upsample=True))
    assert out3.shape == (B, O, 2 * H, 2 * W), out3.shape
    np.testing.assert_allclose(np.asarray(out3), np.asarray(ref), rtol=2e-2, atol=5e-2)

    print("KERNEL_OK")
</pallas_src>

<mosaic_0001>
module attributes {stable_mosaic.version = 11 : i64} {
  func.func @kernel(%arg0: i32, %arg1: memref<6x16xf32, #tpu.memory_space<vmem>>, %arg2: memref<16x256xf32, #tpu.memory_space<vmem>>, %arg3: memref<6x256xf32, #tpu.memory_space<vmem>>, %arg4: memref<256x512xbf16, #tpu.memory_space<vmem>>, %arg5: memref<6x512xf32, #tpu.memory_space<vmem>>) attributes {dimension_semantics = [#tpu.dimension_semantics<parallel>], iteration_bounds = array<i64: 2>, scalar_prefetch = 0 : i64, scratch_operands = 0 : i64, tpu.core_type = #tpu.core_type<tc>, window_params = [{pipeline_mode = #tpu.pipeline_mode<synchronous>, transform_indices = @transform_0, window_bounds = array<i64: 6, 16>}, {pipeline_mode = #tpu.pipeline_mode<synchronous>, transform_indices = @transform_1, window_bounds = array<i64: 16, 256>}, {pipeline_mode = #tpu.pipeline_mode<synchronous>, transform_indices = @transform_2, window_bounds = array<i64: 6, 256>}, {transform_indices = @transform_3, window_bounds = array<i64: 256, 512>}, {transform_indices = @transform_4, window_bounds = array<i64: 6, 512>}]} {
    %c0 = arith.constant 0 : index
    %c0_0 = arith.constant 0 : index
    %0 = vector.load %arg1[%c0, %c0_0] : memref<6x16xf32, #tpu.memory_space<vmem>>, vector<6x16xf32>
    %c0_1 = arith.constant 0 : index
    %c0_2 = arith.constant 0 : index
    %1 = vector.load %arg2[%c0_1, %c0_2] : memref<16x256xf32, #tpu.memory_space<vmem>>, vector<16x256xf32>
    %cst = arith.constant dense<0.000000e+00> : vector<6x256xf32>
    %2 = tpu.matmul %0, %1, %cst {dimension_numbers = #tpu.dot_dimension_numbers<[1], [0], [0], [1], [0, 0, 1, 1], [], []>} : vector<6x16xf32>, vector<16x256xf32>, vector<6x256xf32> -> vector<6x256xf32>
    %c0_3 = arith.constant 0 : index
    %c0_4 = arith.constant 0 : index
    %3 = vector.load %arg3[%c0_3, %c0_4] : memref<6x256xf32, #tpu.memory_space<vmem>>, vector<6x256xf32>
    %4 = arith.addf %2, %3 : vector<6x256xf32>
    %c0_5 = arith.constant 0 : index
    %c0_6 = arith.constant 0 : index
    %5 = vector.load %arg4[%c0_5, %c0_6] : memref<256x512xbf16, #tpu.memory_space<vmem>>, vector<256x512xbf16>
    %6 = arith.truncf %4 : vector<6x256xf32> to vector<6x256xbf16>
    %cst_7 = arith.constant dense<0.000000e+00> : vector<6x512xf32>
    %7 = tpu.matmul %6, %5, %cst_7 {dimension_numbers = #tpu.dot_dimension_numbers<[1], [0], [0], [1], [0, 0, 1, 1], [], []>} : vector<6x256xbf16>, vector<256x512xbf16>, vector<6x512xf32> -> vector<6x512xf32>
    %c0_8 = arith.constant 0 : index
    %c0_9 = arith.constant 0 : index
    %8 = vector.load %arg5[%c0_8, %c0_9] : memref<6x512xf32, #tpu.memory_space<vmem>>, vector<6x512xf32>
    tpu.vector_store %arg5[%c0_8, %c0_9], %7 {strides = array<i32>} : memref<6x512xf32, #tpu.memory_space<vmem>>, vector<6x512xf32>,
    return
  }
  func.func @transform_0(%arg0: i32) -> (i32, i32) {
    %c0_i32 = arith.constant 0 : i32
    %c0_i32_0 = arith.constant 0 : i32
    %c0_i32_1 = arith.constant 0 : i32
    return %c0_i32, %c0_i32_0 : i32, i32
  }
  func.func @transform_1(%arg0: i32) -> (i32, i32) {
    %c0_i32 = arith.constant 0 : i32
    %c0_i32_0 = arith.constant 0 : i32
    %c0_i32_1 = arith.constant 0 : i32
    return %c0_i32, %c0_i32_0 : i32, i32
  }
  func.func @transform_2(%arg0: i32) -> (i32, i32) {
    %c0_i32 = arith.constant 0 : i32
    %c0_i32_0 = arith.constant 0 : i32
    %c0_i32_1 = arith.constant 0 : i32
    return %c0_i32, %c0_i32_0 : i32, i32
  }
  func.func @transform_3(%arg0: i32) -> (i32, i32) {
    %c0_i32 = arith.constant 0 : i32
    %c0_i32_0 = arith.constant 0 : i32
    return %c0_i32, %arg0 : i32, i32
  }
  func.func @transform_4(%arg0: i32) -> (i32, i32) {
    %c0_i32 = arith.constant 0 : i32
    %c0_i32_0 = arith.constant 0 : i32
    return %c0_i32, %arg0 : i32, i32
  }
}

</mosaic_0001>

<bundles_post_ra>
// kernel: _rgb_modconv.1
= control target key start
LH: loop header
LB: loop body
LE: loop exit
PB: predicated region body
PF: predicated region fallthrough
CT: control target
= control target key end

     0   :  { %9 = vsyncpa [#allocation3], 0  ;;  %s1546_s0 = inlined_call_operand.vmem [shape: f32[6,16], index: 0, kind: input, shape index: {}]   ;;  %s1547_s1 = inlined_call_operand.vmem [shape: f32[16,256], index: 1, kind: input, shape index: {}]   ;;  %s1548_s2 = inlined_call_operand.vmem [shape: f32[6,256], index: 2, kind: input, shape index: {}]   ;;  %s1549_s3 = inlined_call_operand.hbm [shape: bf16[256,1024], index: 3, kind: input, shape index: {}]   ;;  %s1550_s4 = inlined_call_operand.vmem [shape: f32[6,1024], index: 4, kind: output, shape index: {}]  }
   0x1   :  { %11 = vsyncpa [#allocation3 + $0x1], 0  ;;  %s1306_s15 = smov 0   ;;  %s1308_s16 = smov 0  }
   0x2   :  { %s1310_s17 = smov 0   ;;  %s1312_s18 = smov 0  }
   0x3 LB: > { %s834_s19 = sadd.s32 4294967295, %s1276_s18   ;;  %s1326_s20 = sadd.s32 1, %s1276_s18   ;;  %s1276_s18 = sphi %s1312_s18, %s1557_s18   ;;  %s1272_s17 = sphi %s1310_s17, %s1556_s17   ;;  %s1268_s16 = sphi %s1308_s16, %s1555_s16   ;;  %s1264_s15 = sphi %s1306_s15, %s1554_s15  }
   0x4   : > { %s84_s21 = ssub.s32 %s1276_s18, %s1326_s20  ;;  %s87_s22 = sadd.s32 1, %s1272_s17 }
   0x5   : > { %p85_p0 = scmp.eq.s32.totalorder %s84_s21, 0  ;;  %p94_p1 = scmp.ne.s32.totalorder %s1272_s17, %s1268_s16 }
   0x6   : > { %p95_p2 = scmp.eq.s32.totalorder %s1276_s18, 0  ;;  %p100_p3 = scmp.ne.s32.totalorder %s1268_s16, %s1264_s15 }
   0x7   : > { %s1336_s23 = scalar_select %p85_p0, %s1272_s17, %s87_s22  }
   0x8   : > { %p1338_p4 = por %p95_p2, %p94_p1  ;;  %p101_p5 = scmp.eq.s32.totalorder %s834_s19, 0 }
   0x9   : > { %p1176_p6 = scmp.lt.s32.totalorder %s1276_s18, 2  ;;  %s159_s26 = sand.u32 1, %s1272_s17  }
   0xa   : > { %p1345_p7 = por %p101_p5, %p100_p3  ;;  %s838_s27 = sshll.u32 %s159_s26, 9 }
   0xb   : > { %s1105_s28 = sshll.u32 %s1276_s18, 4  ;;  %s163_s6 = scalar_lea.vmem [#allocation2], %s838_s27 }
   0xc   : > { %s168_s5 = scalar_lea.hbm %s1549_s3, %s1105_s28  ;;  %s171_s7 = sshll.u32 %s163_s6, 4  ;;  %s172_s7 = int_to_ptr.vmem [resolvable:$true] %s171_s7 }
   0xd   : > { %s169_s8 = sshll.u32 %s168_s5, 4  ;;  %p1356_p8 = pnand %p1176_p6, %p1338_p4  ;;  %s170_s8 = int_to_ptr.hbm [resolvable:$true] %s169_s8 }
   0xe   : > { %s160_s10 = scalar_lea.sflag [#allocation3], %s159_s26  ;;  %s1212_s11 = sshra.s32 %s170_s8, 4  ;;  %s1213_s11 = int_to_ptr.hbm [resolvable:$true] %s1212_s11 }
   0xf   : > { %s1214_s12 = scalar_lea.hbm %s1213_s11, 512  ;;  %p1216_p10 = pneg %p1356_p8 }
  0x10   : > { %p1215_p9 = scmp.ne.s32.totalorder %s1213_s11, %s1214_s12  ;;  %s1219_s15 = scalar_lea.hbm %s1549_s3, 1024 }
  0x11   : > { %p1220_p13 = scmp.lt.s32.totalorder %s1213_s11, %s1549_s3  ;;  %p1221_p0 = scmp.lt.s32.totalorder %s1219_s15, %s1214_s12 }
  0x12   : > { %p1217_p11 = pnand %p1216_p10, %p1215_p9 }
  0x13   : > { %p1222_p1 = por %p1221_p0, %p1220_p13 }
  0x14   : > { %p1218_p12 = pneg %p1217_p11 }
  0x16   : > { %p1223_p2 = pnand %p1222_p1, %p1218_p12 }
  0x18   : > { %1226 = shalt.err (!%p1223_p2)
}
  0x19   : > { %s1278_s24 = smov 512   ;;  %s1279_s26 = smov 256  }
  0x1a   : > { %s1280_s27 = smov 16   ;;  %p841_p3 = scmp.ge.s32.totalorder %s1276_s18, 1 }
  0x1b   : > { %1175 = dma.hbm_to_vmem [thread:$0]  (!%p1356_p8), %s170_s8, 8192, %s172_s7, %s160_s10, %s1278_s24, %s1279_s26, %s1280_s27  }
  0x1c   : > { %p179_p4 = scmp.lt.s32.totalorder %s1276_s18, 3 }
  0x1e   : > { %p180_p5 = pnand %p841_p3, %p179_p4 }
  0x1f   : > { %s185_s28 = sand.u32 (!%p180_p5), 1, %s1268_s16  }
  0x20   : > { %183 = sbr.rel (%p180_p5) target bundleno = 328 (0x148), region = 36  ;;  %s842_s29 = sshll.u32 (!%p180_p5), %s185_s28, 9 }
  0x21   : > { %s186_s30 = scalar_lea.sflag (!%p180_p5), [#allocation3], %s185_s28  ;;  %s1373_s5 = scalar_lea.vmem (!%p180_p5), [#allocation2], %s842_s29 }
  0x25   : > { %1259 = dma.done.wait (%p1345_p7), %s186_s30, 8192  }
  0x26   : > { %1261 = vsyncadd (%p1345_p7), %s186_s30, 4294959104  ;;  %v225_v0 = vld [vmem:[%s1547_s1 + $0x10] sm:$0xff]  ;;  %v226_v1 = vld [vmem:[%s1547_s1 + $0x18] sm:$0xff]  ;;  %vm229_vm0 = vcmask 130048   ;;  %s843_s26 = sshll.u32 %s834_s19, 2 }
  0x27   : > { %v223_v2 = vld [vmem:[%s1547_s1] sm:$0xff]  ;;  %247 = vmatpush.msra.mxu0 %v225_v0  ;;  %267 = vmatpush.msra.mxu1 %v226_v1  ;;  %v224_v3 = vld [vmem:[%s1547_s1 + $0x8] sm:$0xff]  ;;  %v1136_v6 = vld [vmem:[%s1373_s5 + $0xec] sm:$0xf0]  ;;  %p217_p6 = scmp.lt.s32.totalorder %s843_s26, 7 }
  0x28   : > { %v222_v4 = vld [vmem:[%s1546_s0] sm:$0x3f]  ;;  %v1168_v8 = vld [vmem:[%s1373_s5 + $0x1ec] sm:$0xf0]  ;;  %v963_v12 = vld [vmem:[%s1373_s5 + $0xf0] sm:$0xf0] }
  0x29   : > { %v961_v5 = vld [vmem:[%s1373_s5 + $0xe0] sm:$0xf]  ;;  %248 = vmatpush.msra.mxu0 %v223_v2  ;;  %268 = vmatpush.msra.mxu1 %v224_v3  ;;  %v1134_v11 = vld [vmem:[%s1373_s5 + $0xe4] sm:$0xf]  ;;  %v1091_v15 = vld [vmem:[%s1373_s5 + $0x1f0] sm:$0xf0] }
  0x2a   : > { %v1089_v7 = vld [vmem:[%s1373_s5 + $0x1e0] sm:$0xf]  ;;  %v962_v9 = vor.u32 %v1136_v6, %v961_v5  ;;  %v1166_v13 = vld [vmem:[%s1373_s5 + $0x1e4] sm:$0xf]  ;;  %845 = vmatmul.msk.f32.vlgmr.msra.gmra.mxu0 %vm229_vm0, %v222_v4  ;;  %846 = vmatmul.msk.f32.vlgmr.msra.gmra.mxu1 %vm229_vm0, %v222_v4  ;;  %v966_v14 = vor.u32 %v1134_v11, %v963_v12  ;;  %v1132_v17 = vld [vmem:[%s1373_s5 + $0xcc] sm:$0xf0] }
  0x2b   : > { %v1090_v10 = vor.u32 %v1168_v8, %v1089_v7  ;;  %v945_v16 = vld [vmem:[%s1373_s5 + $0xc0] sm:$0xf]  ;;  %v1094_v18 = vor.u32 %v1166_v13, %v1091_v15  ;;  %v1164_v21 = vld [vmem:[%s1373_s5 + $0x1cc] sm:$0xf0]  ;;  %v1130_v22 = vld [vmem:[%s1373_s5 + $0xc4] sm:$0xf] }
  0x2c   : > { %659 = vmatpush.bf16.msra.mxu2 %v962_v9  ;;  %v946_v19 = vor.u32 %v1132_v17, %v945_v16  ;;  %v1073_v20 = vld [vmem:[%s1373_s5 + $0x1c0] sm:$0xf]  ;;  %685 = vmatpush.bf16.msrb.mxu0 %v966_v14  ;;  %v947_v24 = vld [vmem:[%s1373_s5 + $0xd0] sm:$0xf0]  ;;  %v1162_v25 = vld [vmem:[%s1373_s5 + $0x1c4] sm:$0xf] }
  0x2d   : > { %672 = vmatpush.bf16.msra.mxu3 %v1090_v10  ;;  %v1074_v23 = vor.u32 %v1164_v21, %v1073_v20  ;;  %v1075_v26 = vld [vmem:[%s1373_s5 + $0x1d0] sm:$0xf0]  ;;  %698 = vmatpush.bf16.msrb.mxu1 %v1094_v18  ;;  %v950_v27 = vor.u32 %v1130_v22, %v947_v24  ;;  %v929_v29 = vld [vmem:[%s1373_s5 + $0xa0] sm:$0xf]  ;;  %v1128_v30 = vld [vmem:[%s1373_s5 + $0xac] sm:$0xf0] }
  0x2e   : > { %v1078_v28 = vor.u32 %v1162_v25, %v1075_v26  ;;  %v1057_v31 = vld [vmem:[%s1373_s5 + $0x1a0] sm:$0xf]  ;;  %v1160_v32 = vld [vmem:[%s1373_s5 + $0x1ac] sm:$0xf0]  ;;  %v1126_v33 = vld [vmem:[%s1373_s5 + $0xa4] sm:$0xf]  ;;  %v930_v35 = vor.u32 %v1128_v30, %v929_v29 }
  0x2f   : > { %v931_v34 = vld [vmem:[%s1373_s5 + $0xb0] sm:$0xf0]  ;;  %v1058_v36 = vor.u32 %v1160_v32, %v1057_v31  ;;  %v1158_v37 = vld [vmem:[%s1373_s5 + $0x1a4] sm:$0xf]  ;;  %v913_v39 = vld [vmem:[%s1373_s5 + $0x80] sm:$0xf] }
  0x30   : > { %660 = vmatpush.bf16.msra.mxu2 %v946_v19  ;;  %v1059_v38 = vld [vmem:[%s1373_s5 + $0x1b0] sm:$0xf0]  ;;  %686 = vmatpush.bf16.msrb.mxu0 %v950_v27  ;;  %v934_v40 = vor.u32 %v1126_v33, %v931_v34  ;;  %v1124_v41 = vld [vmem:[%s1373_s5 + $0x8c] sm:$0xf0]  ;;  %v1041_v42 = vld [vmem:[%s1373_s5 + $0x180] sm:$0xf] }
  0x31   : > { %673 = vmatpush.bf16.msra.mxu3 %v1074_v23  ;;  %v1156_v43 = vld [vmem:[%s1373_s5 + $0x18c] sm:$0xf0]  ;;  %699 = vmatpush.bf16.msrb.mxu1 %v1078_v28  ;;  %v1062_v44 = vor.u32 %v1158_v37, %v1059_v38  ;;  %v1122_v45 = vld [vmem:[%s1373_s5 + $0x84] sm:$0xf]  ;;  %v915_v46 = vld [vmem:[%s1373_s5 + $0x90] sm:$0xf0]  ;;  %v914_v49 = vor.u32 %v1124_v41, %v913_v39 }
  0x32   : > { %v1154_v47 = vld [vmem:[%s1373_s5 + $0x184] sm:$0xf]  ;;  %v1043_v48 = vld [vmem:[%s1373_s5 + $0x190] sm:$0xf0]  ;;  %v1042_v50 = vor.u32 %v1156_v43, %v1041_v42  ;;  %v897_v51 = vld [vmem:[%s1373_s5 + $0x60] sm:$0xf]  ;;  %v918_v52 = vor.u32 %v1122_v45, %v915_v46 }
  0x33   : > { %v1120_v53 = vld [vmem:[%s1373_s5 + $0x6c] sm:$0xf0]  ;;  %v1025_v54 = vld [vmem:[%s1373_s5 + $0x160] sm:$0xf]  ;;  %v1046_v56 = vor.u32 %v1154_v47, %v1043_v48  ;;  %v1118_v57 = vld [vmem:[%s1373_s5 + $0x64] sm:$0xf] }
  0x34   : > { %661 = vmatpush.bf16.msra.mxu2 %v930_v35  ;;  %687 = vmatpush.bf16.msrb.mxu0 %v934_v40  ;;  %v1152_v55 = vld [vmem:[%s1373_s5 + $0x16c] sm:$0xf0]  ;;  %v899_v58 = vld [vmem:[%s1373_s5 + $0x70] sm:$0xf0]  ;;  %v1150_v59 = vld [vmem:[%s1373_s5 + $0x164] sm:$0xf]  ;;  %v898_v61 = vor.u32 %v1120_v53, %v897_v51 }
  0x35   : > { %674 = vmatpush.bf16.msra.mxu3 %v1058_v36  ;;  %700 = vmatpush.bf16.msrb.mxu1 %v1062_v44  ;;  %v1027_v60 = vld [vmem:[%s1373_s5 + $0x170] sm:$0xf0]  ;;  %v1026_v62 = vor.u32 %v1152_v55, %v1025_v54  ;;  %v881_v63 = vld [vmem:[%s1373_s5 + $0x40] sm:$0xf]  ;;  %v902_v0 = vor.u32 %v1118_v57, %v899_v58  ;;  %v1116_v1 = vld [vmem:[%s1373_s5 + $0x4c] sm:$0xf0] }
  0x36   : > { %v1009_v2 = vld [vmem:[%s1373_s5 + $0x140] sm:$0xf]  ;;  %v1148_v3 = vld [vmem:[%s1373_s5 + $0x14c] sm:$0xf0]  ;;  %v1030_v4 = vor.u32 %v1150_v59, %v1027_v60  ;;  %v1114_v5 = vld [vmem:[%s1373_s5 + $0x44] sm:$0xf]  ;;  %v882_v9 = vor.u32 %v1116_v1, %v881_v63 }
  0x37   : > { %v883_v6 = vld [vmem:[%s1373_s5 + $0x50] sm:$0xf0]  ;;  %v1146_v7 = vld [vmem:[%s1373_s5 + $0x144] sm:$0xf]  ;;  %v1010_v10 = vor.u32 %v1148_v3, %v1009_v2  ;;  %v865_v11 = vld [vmem:[%s1373_s5 + $0x20] sm:$0xf] }
  0x38   : > { %662 = vmatpush.bf16.msra.mxu2 %v914_v49  ;;  %688 = vmatpush.bf16.msrb.mxu0 %v918_v52  ;;  %v1011_v8 = vld [vmem:[%s1373_s5 + $0x150] sm:$0xf0]  ;;  %v886_v12 = vor.u32 %v1114_v5, %v883_v6  ;;  %v1112_v13 = vld [vmem:[%s1373_s5 + $0x2c] sm:$0xf0]  ;;  %v993_v14 = vld [vmem:[%s1373_s5 + $0x120] sm:$0xf] }
  0x39   : > { %675 = vmatpush.bf16.msra.mxu3 %v1042_v50  ;;  %701 = vmatpush.bf16.msrb.mxu1 %v1046_v56  ;;  %v1144_v15 = vld [vmem:[%s1373_s5 + $0x12c] sm:$0xf0]  ;;  %v1014_v16 = vor.u32 %v1146_v7, %v1011_v8  ;;  %v1110_v17 = vld [vmem:[%s1373_s5 + $0x24] sm:$0xf]  ;;  %v867_v18 = vld [vmem:[%s1373_s5 + $0x30] sm:$0xf0]  ;;  %v866_v22 = vor.u32 %v1112_v13, %v865_v11 }
  0x3a   : > { %v1142_v19 = vld [vmem:[%s1373_s5 + $0x124] sm:$0xf]  ;;  %v995_v20 = vld [vmem:[%s1373_s5 + $0x130] sm:$0xf0]  ;;  %v849_v21 = vld [vmem:[%s1373_s5] sm:$0xf]  ;;  %v994_v23 = vor.u32 %v1144_v15, %v993_v14  ;;  %v870_v27 = vor.u32 %v1110_v17, %v867_v18 }
  0x3b   : > { %v1108_v24 = vld [vmem:[%s1373_s5 + $0xc] sm:$0xf0]  ;;  %v977_v25 = vld [vmem:[%s1373_s5 + $0x100] sm:$0xf]  ;;  %v1106_v28 = vld [vmem:[%s1373_s5 + $0x4] sm:$0xf]  ;;  %v998_v31 = vor.u32 %v1142_v19, %v995_v20 }
  0x3c   : > { %663 = vmatpush.bf16.msra.mxu2 %v898_v61  ;;  %689 = vmatpush.bf16.msrb.mxu0 %v902_v0  ;;  %v1140_v26 = vld [vmem:[%s1373_s5 + $0x10c] sm:$0xf0]  ;;  %v851_v29 = vld [vmem:[%s1373_s5 + $0x10] sm:$0xf0]  ;;  %v1138_v30 = vld [vmem:[%s1373_s5 + $0x104] sm:$0xf]  ;;  %v850_v38 = vor.u32 %v1108_v24, %v849_v21 }
  0x3d   : > { %676 = vmatpush.bf16.msra.mxu3 %v1026_v62  ;;  %702 = vmatpush.bf16.msrb.mxu1 %v1030_v4  ;;  %v979_v32 = vld [vmem:[%s1373_s5 + $0x110] sm:$0xf0]  ;;  %v969_v33 = vld [vmem:[%s1373_s5 + $0xe8] sm:$0xf]  ;;  %v1137_v34 = vld [vmem:[%s1373_s5 + $0xf4] sm:$0xf0]  ;;  %v978_v39 = vor.u32 %v1140_v26, %v977_v25  ;;  %v854_v43 = vor.u32 %v1106_v28, %v851_v29 }
  0x3e   : > { %v1097_v35 = vld [vmem:[%s1373_s5 + $0x1e8] sm:$0xf]  ;;  %v1169_v36 = vld [vmem:[%s1373_s5 + $0x1f4] sm:$0xf0]  ;;  %v1135_v37 = vld [vmem:[%s1373_s5 + $0xec] sm:$0xf]  ;;  %v970_v44 = vor.u32 %v1137_v34, %v969_v33  ;;  %v982_v45 = vor.u32 %v1138_v30, %v979_v32 }
  0x3f   : > { %v971_v40 = vld [vmem:[%s1373_s5 + $0xf8] sm:$0xf0]  ;;  %v1167_v41 = vld [vmem:[%s1373_s5 + $0x1ec] sm:$0xf]  ;;  %v1098_v46 = vor.u32 %v1169_v36, %v1097_v35  ;;  %v953_v47 = vld [vmem:[%s1373_s5 + $0xc8] sm:$0xf] }
  0x40   : > { %664 = vmatpush.bf16.msra.mxu2 %v882_v9  ;;  %690 = vmatpush.bf16.msrb.mxu0 %v886_v12  ;;  %v1099_v42 = vld [vmem:[%s1373_s5 + $0x1f8] sm:$0xf0]  ;;  %v1133_v48 = vld [vmem:[%s1373_s5 + $0xd4] sm:$0xf0]  ;;  %v974_v49 = vor.u32 %v1135_v37, %v971_v40  ;;  %v1081_v51 = vld [vmem:[%s1373_s5 + $0x1c8] sm:$0xf] }
  0x41   : > { %677 = vmatpush.bf16.msra.mxu3 %v1010_v10  ;;  %703 = vmatpush.bf16.msrb.mxu1 %v1014_v16  ;;  %v1102_v50 = vor.u32 %v1167_v41, %v1099_v42  ;;  %v1165_v52 = vld [vmem:[%s1373_s5 + $0x1d4] sm:$0xf0]  ;;  %v1131_v53 = vld [vmem:[%s1373_s5 + $0xcc] sm:$0xf]  ;;  %v955_v54 = vld [vmem:[%s1373_s5 + $0xd8] sm:$0xf0]  ;;  %v954_v57 = vor.u32 %v1133_v48, %v953_v47 }
  0x42   : > { %v1163_v55 = vld [vmem:[%s1373_s5 + $0x1cc] sm:$0xf]  ;;  %v1083_v56 = vld [vmem:[%s1373_s5 + $0x1d8] sm:$0xf0]  ;;  %v1082_v58 = vor.u32 %v1165_v52, %v1081_v51  ;;  %v937_v59 = vld [vmem:[%s1373_s5 + $0xa8] sm:$0xf]  ;;  %v958_v61 = vor.u32 %v1131_v53, %v955_v54 }
  0x43   : > { %v1129_v60 = vld [vmem:[%s1373_s5 + $0xb4] sm:$0xf0]  ;;  %v1086_v62 = vor.u32 %v1163_v55, %v1083_v56  ;;  %v1065_v63 = vld [vmem:[%s1373_s5 + $0x1a8] sm:$0xf]  ;;  %v1127_v1 = vld [vmem:[%s1373_s5 + $0xac] sm:$0xf] }
  0x44   : > { %665 = vmatpush.bf16.msra.mxu2 %v866_v22  ;;  %691 = vmatpush.bf16.msrb.mxu0 %v870_v27  ;;  %v1161_v0 = vld [vmem:[%s1373_s5 + $0x1b4] sm:$0xf0]  ;;  %v939_v2 = vld [vmem:[%s1373_s5 + $0xb8] sm:$0xf0]  ;;  %v1159_v3 = vld [vmem:[%s1373_s5 + $0x1ac] sm:$0xf]  ;;  %v938_v5 = vor.u32 %v1129_v60, %v937_v59 }
  0x45   : > { %678 = vmatpush.bf16.msra.mxu3 %v994_v23  ;;  %704 = vmatpush.bf16.msrb.mxu1 %v998_v31  ;;  %v1067_v4 = vld [vmem:[%s1373_s5 + $0x1b8] sm:$0xf0]  ;;  %v1066_v6 = vor.u32 %v1161_v0, %v1065_v63  ;;  %v942_v7 = vor.u32 %v1127_v1, %v939_v2  ;;  %v921_v9 = vld [vmem:[%s1373_s5 + $0x88] sm:$0xf]  ;;  %v1125_v10 = vld [vmem:[%s1373_s5 + $0x94] sm:$0xf0] }
  0x46   : > { %v1070_v8 = vor.u32 %v1159_v3, %v1067_v4  ;;  %v1049_v11 = vld [vmem:[%s1373_s5 + $0x188] sm:$0xf]  ;;  %v922_v12 = vor.u32 %v1125_v10, %v921_v9  ;;  %v1157_v13 = vld [vmem:[%s1373_s5 + $0x194] sm:$0xf0]  ;;  %v1123_v14 = vld [vmem:[%s1373_s5 + $0x8c] sm:$0xf] }
  0x47   : > { %v1050_v15 = vor.u32 %v1157_v13, %v1049_v11  ;;  %v923_v16 = vld [vmem:[%s1373_s5 + $0x98] sm:$0xf0]  ;;  %v1155_v17 = vld [vmem:[%s1373_s5 + $0x18c] sm:$0xf]  ;;  %v905_v21 = vld [vmem:[%s1373_s5 + $0x68] sm:$0xf] }
  0x48   : > { %666 = vmatpush.bf16.msra.mxu2 %v850_v38  ;;  %692 = vmatpush.bf16.msrb.mxu0 %v854_v43  ;;  %v1051_v18 = vld [vmem:[%s1373_s5 + $0x198] sm:$0xf0]  ;;  %v926_v19 = vor.u32 %v1123_v14, %v923_v16  ;;  %v1121_v22 = vld [vmem:[%s1373_s5 + $0x74] sm:$0xf0]  ;;  %v1033_v23 = vld [vmem:[%s1373_s5 + $0x168] sm:$0xf] }
  0x49   : > { %679 = vmatpush.bf16.msra.mxu3 %v978_v39  ;;  %705 = vmatpush.bf16.msrb.mxu1 %v982_v45  ;;  %v1054_v20 = vor.u32 %v1155_v17, %v1051_v18  ;;  %v906_v24 = vor.u32 %v1121_v22, %v905_v21  ;;  %v1153_v25 = vld [vmem:[%s1373_s5 + $0x174] sm:$0xf0]  ;;  %v1119_v26 = vld [vmem:[%s1373_s5 + $0x6c] sm:$0xf]  ;;  %v907_v27 = vld [vmem:[%s1373_s5 + $0x78] sm:$0xf0] }
  0x4a   : > { %v1034_v28 = vor.u32 %v1153_v25, %v1033_v23  ;;  %v910_v29 = vor.u32 %v1119_v26, %v907_v27  ;;  %v1151_v30 = vld [vmem:[%s1373_s5 + $0x16c] sm:$0xf]  ;;  %v1035_v31 = vld [vmem:[%s1373_s5 + $0x178] sm:$0xf0]  ;;  %v889_v32 = vld [vmem:[%s1373_s5 + $0x48] sm:$0xf] }
  0x4b   : > { %v1038_v33 = vor.u32 %v1151_v30, %v1035_v31  ;;  %v1117_v34 = vld [vmem:[%s1373_s5 + $0x54] sm:$0xf0]  ;;  %v1017_v35 = vld [vmem:[%s1373_s5 + $0x148] sm:$0xf]  ;;  %v1115_v39 = vld [vmem:[%s1373_s5 + $0x4c] sm:$0xf] }
  0x4c   : > { %711 = vmatpush.bf16.msrb.mxu2 %v970_v44  ;;  %737 = vmatpush.bf16.msra.mxu0 %v974_v49  ;;  %v1149_v36 = vld [vmem:[%s1373_s5 + $0x154] sm:$0xf0]  ;;  %v890_v37 = vor.u32 %v1117_v34, %v889_v32  ;;  %v891_v40 = vld [vmem:[%s1373_s5 + $0x58] sm:$0xf0]  ;;  %v1147_v41 = vld [vmem:[%s1373_s5 + $0x14c] sm:$0xf] }
  0x4d   : > { %724 = vmatpush.bf16.msrb.mxu3 %v1098_v46  ;;  %750 = vmatpush.bf16.msra.mxu1 %v1102_v50  ;;  %v1018_v38 = vor.u32 %v1149_v36, %v1017_v35  ;;  %v894_v42 = vor.u32 %v1115_v39, %v891_v40  ;;  %v1019_v43 = vld [vmem:[%s1373_s5 + $0x158] sm:$0xf0]  ;;  %v873_v44 = vld [vmem:[%s1373_s5 + $0x28] sm:$0xf]  ;;  %v1113_v45 = vld [vmem:[%s1373_s5 + $0x34] sm:$0xf0] }
  0x4e   : > { %v1022_v46 = vor.u32 %v1147_v41, %v1019_v43  ;;  %v1001_v47 = vld [vmem:[%s1373_s5 + $0x128] sm:$0xf]  ;;  %v1145_v48 = vld [vmem:[%s1373_s5 + $0x134] sm:$0xf0]  ;;  %v1111_v49 = vld [vmem:[%s1373_s5 + $0x2c] sm:$0xf]  ;;  %v874_v50 = vor.u32 %v1113_v45, %v873_v44 }
  0x4f   : > { %v875_v51 = vld [vmem:[%s1373_s5 + $0x38] sm:$0xf0]  ;;  %v1143_v52 = vld [vmem:[%s1373_s5 + $0x12c] sm:$0xf]  ;;  %v1002_v54 = vor.u32 %v1145_v48, %v1001_v47  ;;  %v857_v56 = vld [vmem:[%s1373_s5 + $0x8] sm:$0xf] }
  0x50   : > { %712 = vmatpush.bf16.msrb.mxu2 %v954_v57  ;;  %738 = vmatpush.bf16.msra.mxu0 %v958_v61  ;;  %v1003_v53 = vld [vmem:[%s1373_s5 + $0x138] sm:$0xf0]  ;;  %v878_v55 = vor.u32 %v1111_v49, %v875_v51  ;;  %v1109_v57 = vld [vmem:[%s1373_s5 + $0x14] sm:$0xf0]  ;;  %v1107_v61 = vld [vmem:[%s1373_s5 + $0xc] sm:$0xf] }
  0x51   : > { %725 = vmatpush.bf16.msrb.mxu3 %v1082_v58  ;;  %751 = vmatpush.bf16.msra.mxu1 %v1086_v62  ;;  %v985_v58 = vld [vmem:[%s1373_s5 + $0x108] sm:$0xf]  ;;  %v1006_v59 = vor.u32 %v1143_v52, %v1003_v53  ;;  %v1141_v60 = vld [vmem:[%s1373_s5 + $0x114] sm:$0xf0]  ;;  %v859_v62 = vld [vmem:[%s1373_s5 + $0x18] sm:$0xf0]  ;;  %v858_v1 = vor.u32 %v1109_v57, %v857_v56 }
  0x52   : > { %v1139_v63 = vld [vmem:[%s1373_s5 + $0x10c] sm:$0xf]  ;;  %v987_v0 = vld [vmem:[%s1373_s5 + $0x118] sm:$0xf0]  ;;  %v986_v2 = vor.u32 %v1141_v60, %v985_v58  ;;  %v862_v3 = vor.u32 %v1107_v61, %v859_v62  ;;  %s1559_s26 = smov (!%p217_p6, %s843_s26), 7 }
  0x53   : > { %v990_v4 = vor.u32 %v1139_v63, %v987_v0  ;;  %s844_s27 = sshll.u32 %s1559_s26, 3 }
  0x54   : > { %713 = vmatpush.bf16.msrb.mxu2 %v938_v5  ;;  %739 = vmatpush.bf16.msra.mxu0 %v942_v7  ;;  %v227_v5 = vld [vmem:[%s1548_s2] sm:$0x3f]  ;;  %s220_s30 = scalar_lea.vmem %s1550_s4, %s844_s27 }
  0x55   : > { %726 = vmatpush.bf16.msrb.mxu3 %v1066_v6  ;;  %752 = vmatpush.bf16.msra.mxu1 %v1070_v8  ;;  %v228_v6 = vld [vmem:[%s1548_s2 + $0x8] sm:$0x3f] }
  0x58   : > { %714 = vmatpush.bf16.msrb.mxu2 %v922_v12  ;;  %740 = vmatpush.bf16.msra.mxu0 %v926_v19 }
  0x59   : > { %727 = vmatpush.bf16.msrb.mxu3 %v1050_v15  ;;  %753 = vmatpush.bf16.msra.mxu1 %v1054_v20 }
  0x5c   : > { %715 = vmatpush.bf16.msrb.mxu2 %v906_v24  ;;  %741 = vmatpush.bf16.msra.mxu0 %v910_v29 }
  0x5d   : > { %728 = vmatpush.bf16.msrb.mxu3 %v1034_v28  ;;  %754 = vmatpush.bf16.msra.mxu1 %v1038_v33 }
  0x60   : > { %716 = vmatpush.bf16.msrb.mxu2 %v890_v37  ;;  %742 = vmatpush.bf16.msra.mxu0 %v894_v42 }
  0x61   : > { %729 = vmatpush.bf16.msrb.mxu3 %v1018_v38  ;;  %755 = vmatpush.bf16.msra.mxu1 %v1022_v46 }
  0x64   : > { %717 = vmatpush.bf16.msrb.mxu2 %v874_v50  ;;  %743 = vmatpush.bf16.msra.mxu0 %v878_v55 }
  0x65   : > { %730 = vmatpush.bf16.msrb.mxu3 %v1002_v54  ;;  %756 = vmatpush.bf16.msra.mxu1 %v1006_v59 }
  0x68   : > { %718 = vmatpush.bf16.msrb.mxu2 %v858_v1  ;;  %744 = vmatpush.bf16.msra.mxu0 %v862_v3 }
  0x69   : > { %731 = vmatpush.bf16.msrb.mxu3 %v986_v2  ;;  %757 = vmatpush.bf16.msra.mxu1 %v990_v4 }
  0xa7   : > { %v250_v7 = vpop.f32.mrf.mxu0  ;;  %v270_v8 = vpop.f32.mrf.mxu1 }
  0xa8   : > { %v251_v9 = vadd.f32 %v250_v7, %v227_v5  ;;  %v271_v10 = vadd.f32 %v270_v8, %v228_v6 }
  0xaa   : > { %v337_v11 = vpack.c.bf16 %v251_v9, %v251_v9  ;;  %v338_v12 = vpack.c.bf16 %v271_v10, %v271_v10 }
  0xac   : > { %667 = vmatmul.bf16.vlgmr.msra.gmra.mxu2 %v337_v11  ;;  %680 = vmatmul.bf16.vlgmr.msra.gmra.mxu3 %v338_v12 }
  0xad   : > { %693 = vmatmul.bf16.vlgmr.msrb.gmra.mxu0 %v337_v11  ;;  %706 = vmatmul.bf16.vlgmr.msrb.gmra.mxu1 %v338_v12 }
  0xbc   : > { %719 = vmatmul.bf16.vlgmr.msrb.gmra.mxu2 %v337_v11  ;;  %732 = vmatmul.bf16.vlgmr.msrb.gmra.mxu3 %v338_v12 }
  0xbd   : > { %745 = vmatmul.bf16.vlgmr.msra.gmra.mxu0 %v337_v11  ;;  %758 = vmatmul.bf16.vlgmr.msra.gmra.mxu1 %v338_v12 }
 0x12a   : > { %v694_v13 = vpop.f32.mrf.mxu0  ;;  %v707_v14 = vpop.f32.mrf.mxu1 }
 0x12b   : > { %v708_v18 = vadd.f32 %v707_v14, %v694_v13 }
 0x12d   : > { %764 = vst [vmem:[%s220_s30 + $0x8] sm:$0x3f] %v708_v18 }
 0x12f   : > { %v668_v15 = vpop.f32.mrf.mxu2  ;;  %v681_v16 = vpop.f32.mrf.mxu3 }
 0x130   : > { %v682_v17 = vadd.f32 %v681_v16, %v668_v15 }
 0x132   : > { %763 = vst [vmem:[%s220_s30] sm:$0x3f] %v682_v17  ;;  %v696_v19 = vpop.f32.mrf.mxu0  ;;  %v709_v20 = vpop.f32.mrf.mxu1 }
 0x137   : > { %v670_v21 = vpop.f32.mrf.mxu2  ;;  %v683_v22 = vpop.f32.mrf.mxu3 }
 0x13a   : > { %v746_v23 = vpop.f32.mrf.mxu0  ;;  %v759_v24 = vpop.f32.mrf.mxu1 }
 0x13b   : > { %v760_v28 = vadd.f32 %v759_v24, %v746_v23 }
 0x13d   : > { %766 = vst [vmem:[%s220_s30 + $0x18] sm:$0x3f] %v760_v28 }
 0x13f   : > { %v720_v25 = vpop.f32.mrf.mxu2  ;;  %v733_v26 = vpop.f32.mrf.mxu3 }
 0x140   : > { %v734_v27 = vadd.f32 %v733_v26, %v720_v25 }
 0x142   : > { %765 = vst [vmem:[%s220_s30 + $0x10] sm:$0x3f] %v734_v27  ;;  %v748_v29 = vpop.f32.mrf.mxu0  ;;  %v761_v30 = vpop.f32.mrf.mxu1 }
 0x147   : > { %v722_v31 = vpop.f32.mrf.mxu2  ;;  %v735_v32 = vpop.f32.mrf.mxu3 }
 0x148 PF: > { %p14_p7 = scmp.ge.s32.totalorder %s1326_s20, 4   ;;  %s1554_s15 = smov %s1268_s16 }
 0x149   : > { %s1555_s16 = smov %s1272_s17  ;;  %s1556_s17 = smov %s1336_s23 }
 0x14a   : > { %s1557_s18 = smov %s1326_s20  ;;  %16 = sbr.rel (!%p14_p7) target bundleno = 3 (0x3), region = 76 }
 0x14f   :  { %789 = vsyncpa [#allocation3], 1 }
 0x150   :  { %791 = vsyncpa [#allocation3 + $0x1], 1 }

</bundles_post_ra>
